<compile_context>
chip_gen: v6e
topology: v6e:2x2x1
jax: 0.10.0
libtpu: 0.0.40
codegen_flags: <defaults>
</compile_context>

<pallas_src>
import jax
import jax.numpy as jnp
from jax.experimental import pallas as pl
from jax.experimental.pallas import tpu as pltpu


# ----------------------------- Pallas kernels ------------------------------

def _sobel_fuse_kernel(im_ref, out_ref, bmin_ref, bmax_ref):
    """Per-batch: image passthrough + Sobel magnitude + per-batch min/max.

    im_ref:   (1, C, H, W)    VMEM input block
    out_ref:  (1, C+1, H, W)  VMEM output block (channels 0..C-1 = image,
                              channel C interior = un-normalized magnitude)
    bmin_ref: (1, 1, 1)       VMEM per-batch magnitude min
    bmax_ref: (1, 1, 1)       VMEM per-batch magnitude max
    """
    c = im_ref.shape[1]
    h, w = im_ref.shape[2], im_ref.shape[3]
    hm, wm = h - 2, w - 2

    r = im_ref[0, 0]
    g = im_ref[0, 1]
    b = im_ref[0, 2]
    gray = 0.299 * r + 0.587 * g + 0.114 * b                 # (H, W)

    # Separable Sobel on the valid region (pure in-register shifted slices):
    #   kx = [1,2,1]^T (rows) x [-1,0,1] (cols)
    #   ky = [-1,0,1]^T (rows) x [1,2,1] (cols)
    sv = gray[0:hm, :] + 2.0 * gray[1:hm + 1, :] + gray[2:hm + 2, :]   # (hm, W)
    gradx = sv[:, 2:wm + 2] - sv[:, 0:wm]                              # (hm, wm)
    sh = gray[:, 0:wm] + 2.0 * gray[:, 1:wm + 1] + gray[:, 2:wm + 2]   # (H, wm)
    grady = sh[2:hm + 2, :] - sh[0:hm, :]                              # (hm, wm)
    mag = jnp.sqrt(gradx * gradx + grady * grady)

    # Image channels pass straight through: one contiguous lane-dense store.
    out_ref[0, 0:c] = im_ref[0]
    # Un-normalized magnitude into the interior of channel C. The 1-pixel
    # border is intentionally left unwritten here: kernel 2 rewrites the whole
    # channel-C plane with a single full-width aligned store that forces the
    # border to zero, so a second (zeroing) store here would be wasted traffic.
    out_ref[0, c, 1:1 + hm, 1:1 + wm] = mag

    # Per-batch min/max (over the valid region only -> global min/max is exact).
    bmin_ref[0] = jnp.min(mag, keepdims=True)
    bmax_ref[0] = jnp.max(mag, keepdims=True)


def _normalize_pad_kernel(mag_ref, params_ref, out_ref):
    """Per-batch in-place normalization of channel C with zero border.

    mag_ref:    (1, 1, H, W)  VMEM (channel C of the aliased output buffer)
    params_ref: (2,)          SMEM: [global_min, 1/(global_max - global_min)]
    out_ref:    (1, 1, H, W)  VMEM (same HBM buffer via input_output_aliases)
    """
    h, w = out_ref.shape[2], out_ref.shape[3]
    gmin = params_ref[0]
    inv = params_ref[1]

    plane = mag_ref[0, 0]                                    # (H, W)
    normed = (plane - gmin) * inv                            # hoisted reciprocal

    row = jax.lax.broadcasted_iota(jnp.int32, (h, w), 0)
    col = jax.lax.broadcasted_iota(jnp.int32, (h, w), 1)
    interior = (row >= 1) & (row < h - 1) & (col >= 1) & (col < w - 1)
    # Single full-width, lane-aligned store; border forced to exact zero.
    out_ref[0, 0] = jnp.where(interior, normed, 0.0)


# ----------------------------- forward wrapper ------------------------------

def sobel_net_forward(im):
    """im: (N, C>=3, H, W) float32 NCHW. Returns (N, C+1, H, W) float32."""
    N, C, H, W = im.shape
    assert C >= 3 and H >= 3 and W >= 3
    im = im.astype(jnp.float32)

    cparams = pltpu.CompilerParams(
        dimension_semantics=("parallel",),          # megacore-shardable on v7x
        vmem_limit_bytes=32 * 1024 * 1024)

    # Pass 1: image passthrough + Sobel magnitude into the final buffer,
    # plus per-batch min/max. Fully parallel over batch.
    out, bmin, bmax = pl.pallas_call(
        _sobel_fuse_kernel,
        out_shape=(jax.ShapeDtypeStruct((N, C + 1, H, W), jnp.float32),
                   jax.ShapeDtypeStruct((N, 1, 1), jnp.float32),
                   jax.ShapeDtypeStruct((N, 1, 1), jnp.float32)),
        grid_spec=pltpu.PrefetchScalarGridSpec(
            num_scalar_prefetch=0,
            grid=(N,),
            in_specs=[pl.BlockSpec((1, C, H, W), lambda bi: (bi, 0, 0, 0))],
            out_specs=[
                pl.BlockSpec((1, C + 1, H, W), lambda bi: (bi, 0, 0, 0)),
                pl.BlockSpec((1, 1, 1), lambda bi: (bi, 0, 0)),
                pl.BlockSpec((1, 1, 1), lambda bi: (bi, 0, 0)),
            ]),
        compiler_params=cparams,
    )(im)

    # Tiny global reduction + reciprocal hoist (scalar work in the wrapper).
    gmin = jnp.min(bmin)
    gmax = jnp.max(bmax)
    norm_params = jnp.stack([gmin, 1.0 / (gmax - gmin)]).astype(jnp.float32)

    # Pass 2: normalize channel C in place (aliased output buffer); the other
    # channels are never re-read or re-written.
    out = pl.pallas_call(
        _normalize_pad_kernel,
        out_shape=jax.ShapeDtypeStruct((N, C + 1, H, W), jnp.float32),
        grid_spec=pltpu.PrefetchScalarGridSpec(
            num_scalar_prefetch=0,
            grid=(N,),
            in_specs=[
                pl.BlockSpec((1, 1, H, W), lambda bi: (bi, C, 0, 0)),
                pl.BlockSpec(memory_space=pltpu.MemorySpace.SMEM),
            ],
            out_specs=pl.BlockSpec((1, 1, H, W), lambda bi: (bi, C, 0, 0))),
        input_output_aliases={0: 0},
        compiler_params=cparams,
    )(out, norm_params)
    return out


# ----------------------------- reference (pure JAX) -------------------------

def _reference(im):
    im = im.astype(jnp.float32)
    gray = 0.299 * im[:, 0] + 0.587 * im[:, 1] + 0.114 * im[:, 2]
    Hm, Wm = gray.shape[1] - 2, gray.shape[2] - 2
    kx = jnp.array([[-1, 0, 1], [-2, 0, 2], [-1, 0, 1]], jnp.float32)
    ky = jnp.array([[-1, -2, -1], [0, 0, 0], [1, 2, 1]], jnp.float32)

    def conv(g, k):
        out = jnp.zeros((g.shape[0], Hm, Wm), jnp.float32)
        for di in range(3):
            for dj in range(3):
                out = out + k[di, dj] * g[:, di:di + Hm, dj:dj + Wm]
        return out

    gx, gy = conv(gray, kx), conv(gray, ky)
    mag = jnp.sqrt(gx * gx + gy * gy)
    mag = (mag - jnp.min(mag)) / (jnp.max(mag) - jnp.min(mag))
    mag = jnp.pad(mag, ((0, 0), (1, 1), (1, 1)))
    return jnp.concatenate([im, mag[:, None]], axis=1)


if __name__ == "__main__":
    key = jax.random.PRNGKey(0)
    x = jax.random.uniform(key, (2, 3, 16, 16), jnp.float32)

    fwd = jax.jit(sobel_net_forward)
    out = fwd(x)
    jax.block_until_ready(out)

    assert out.shape == (2, 4, 16, 16), out.shape
    assert bool(jnp.all(jnp.isfinite(out)))

    ref = _reference(x)
    err = float(jnp.max(jnp.abs(out - ref)))
    assert err < 1e-4, f"max abs error vs reference: {err}"

    print("KERNEL_OK")
</pallas_src>

<mosaic_0001>
module attributes {stable_mosaic.version = 11 : i64} {
  func.func @_sobel_fuse_kernel(%arg0: i32, %arg1: memref<1x3x16x16xf32, #tpu.memory_space<vmem>>, %arg2: memref<1x4x16x16xf32, #tpu.memory_space<vmem>>, %arg3: memref<1x1x1xf32, #tpu.memory_space<vmem>>, %arg4: memref<1x1x1xf32, #tpu.memory_space<vmem>>) attributes {dimension_semantics = [#tpu.dimension_semantics<parallel>], iteration_bounds = array<i64: 2>, scalar_prefetch = 0 : i64, scratch_operands = 0 : i64, tpu.core_type = #tpu.core_type<tc>, window_params = [{transform_indices = @transform_0, window_bounds = array<i64: 1, 3, 16, 16>}, {transform_indices = @transform_1, window_bounds = array<i64: 1, 4, 16, 16>}, {transform_indices = @transform_2, window_bounds = array<i64: 1, 1, 1>}, {transform_indices = @transform_3, window_bounds = array<i64: 1, 1, 1>}]} {
    %c0 = arith.constant 0 : index
    %c0_0 = arith.constant 0 : index
    %c0_1 = arith.constant 0 : index
    %c0_2 = arith.constant 0 : index
    %0 = vector.load %arg1[%c0, %c0_0, %c0_1, %c0_2] : memref<1x3x16x16xf32, #tpu.memory_space<vmem>>, vector<1x1x16x16xf32>
    %1 = vector.shape_cast %0 : vector<1x1x16x16xf32> to vector<16x16xf32>
    %c0_3 = arith.constant 0 : index
    %c1 = arith.constant 1 : index
    %c0_4 = arith.constant 0 : index
    %c0_5 = arith.constant 0 : index
    %2 = vector.load %arg1[%c0_3, %c1, %c0_4, %c0_5] : memref<1x3x16x16xf32, #tpu.memory_space<vmem>>, vector<1x1x16x16xf32>
    %3 = vector.shape_cast %2 : vector<1x1x16x16xf32> to vector<16x16xf32>
    %c0_6 = arith.constant 0 : index
    %c2 = arith.constant 2 : index
    %c0_7 = arith.constant 0 : index
    %c0_8 = arith.constant 0 : index
    %4 = vector.load %arg1[%c0_6, %c2, %c0_7, %c0_8] : memref<1x3x16x16xf32, #tpu.memory_space<vmem>>, vector<1x1x16x16xf32>
    %5 = vector.shape_cast %4 : vector<1x1x16x16xf32> to vector<16x16xf32>
    %cst = arith.constant 2.990000e-01 : f32
    %6 = vector.broadcast %cst : f32 to vector<16x16xf32>
    %7 = arith.mulf %6, %1 : vector<16x16xf32>
    %cst_9 = arith.constant 5.870000e-01 : f32
    %8 = vector.broadcast %cst_9 : f32 to vector<16x16xf32>
    %9 = arith.mulf %8, %3 : vector<16x16xf32>
    %10 = arith.addf %7, %9 : vector<16x16xf32>
    %cst_10 = arith.constant 1.140000e-01 : f32
    %11 = vector.broadcast %cst_10 : f32 to vector<16x16xf32>
    %12 = arith.mulf %11, %5 : vector<16x16xf32>
    %13 = arith.addf %10, %12 : vector<16x16xf32>
    %14 = vector.extract_strided_slice %13 {offsets = [0, 0], sizes = [14, 16], strides = [1, 1]} : vector<16x16xf32> to vector<14x16xf32>
    %15 = vector.extract_strided_slice %13 {offsets = [1, 0], sizes = [14, 16], strides = [1, 1]} : vector<16x16xf32> to vector<14x16xf32>
    %cst_11 = arith.constant 2.000000e+00 : f32
    %16 = vector.broadcast %cst_11 : f32 to vector<14x16xf32>
    %17 = arith.mulf %16, %15 : vector<14x16xf32>
    %18 = arith.addf %14, %17 : vector<14x16xf32>
    %19 = vector.extract_strided_slice %13 {offsets = [2, 0], sizes = [14, 16], strides = [1, 1]} : vector<16x16xf32> to vector<14x16xf32>
    %20 = arith.addf %18, %19 : vector<14x16xf32>
    %21 = vector.extract_strided_slice %20 {offsets = [0, 2], sizes = [14, 14], strides = [1, 1]} : vector<14x16xf32> to vector<14x14xf32>
    %22 = vector.extract_strided_slice %20 {offsets = [0, 0], sizes = [14, 14], strides = [1, 1]} : vector<14x16xf32> to vector<14x14xf32>
    %23 = arith.subf %21, %22 : vector<14x14xf32>
    %24 = vector.extract_strided_slice %13 {offsets = [0, 0], sizes = [16, 14], strides = [1, 1]} : vector<16x16xf32> to vector<16x14xf32>
    %25 = vector.extract_strided_slice %13 {offsets = [0, 1], sizes = [16, 14], strides = [1, 1]} : vector<16x16xf32> to vector<16x14xf32>
    %cst_12 = arith.constant 2.000000e+00 : f32
    %26 = vector.broadcast %cst_12 : f32 to vector<16x14xf32>
    %27 = arith.mulf %26, %25 : vector<16x14xf32>
    %28 = arith.addf %24, %27 : vector<16x14xf32>
    %29 = vector.extract_strided_slice %13 {offsets = [0, 2], sizes = [16, 14], strides = [1, 1]} : vector<16x16xf32> to vector<16x14xf32>
    %30 = arith.addf %28, %29 : vector<16x14xf32>
    %31 = vector.extract_strided_slice %30 {offsets = [2, 0], sizes = [14, 14], strides = [1, 1]} : vector<16x14xf32> to vector<14x14xf32>
    %32 = vector.extract_strided_slice %30 {offsets = [0, 0], sizes = [14, 14], strides = [1, 1]} : vector<16x14xf32> to vector<14x14xf32>
    %33 = arith.subf %31, %32 : vector<14x14xf32>
    %34 = arith.mulf %23, %23 : vector<14x14xf32>
    %35 = arith.mulf %33, %33 : vector<14x14xf32>
    %36 = arith.addf %34, %35 : vector<14x14xf32>
    %37 = math.sqrt %36 : vector<14x14xf32>
    %c0_13 = arith.constant 0 : index
    %c0_14 = arith.constant 0 : index
    %c0_15 = arith.constant 0 : index
    %c0_16 = arith.constant 0 : index
    %38 = vector.load %arg1[%c0_13, %c0_14, %c0_15, %c0_16] : memref<1x3x16x16xf32, #tpu.memory_space<vmem>>, vector<1x3x16x16xf32>
    %39 = vector.shape_cast %38 : vector<1x3x16x16xf32> to vector<3x16x16xf32>
    %c0_17 = arith.constant 0 : index
    %c0_18 = arith.constant 0 : index
    %c0_19 = arith.constant 0 : index
    %c0_20 = arith.constant 0 : index
    %40 = vector.load %arg2[%c0_17, %c0_18, %c0_19, %c0_20] : memref<1x4x16x16xf32, #tpu.memory_space<vmem>>, vector<1x3x16x16xf32>
    %41 = vector.shape_cast %40 : vector<1x3x16x16xf32> to vector<3x16x16xf32>
    %42 = vector.shape_cast %39 : vector<3x16x16xf32> to vector<1x3x16x16xf32>
    tpu.vector_store %arg2[%c0_17, %c0_18, %c0_19, %c0_20], %42 {strides = array<i32>} : memref<1x4x16x16xf32, #tpu.memory_space<vmem>>, vector<1x3x16x16xf32>,
    %c0_21 = arith.constant 0 : index
    %c3 = arith.constant 3 : index
    %c1_22 = arith.constant 1 : index
    %c1_23 = arith.constant 1 : index
    %43 = vector.load %arg2[%c0_21, %c3, %c1_22, %c1_23] : memref<1x4x16x16xf32, #tpu.memory_space<vmem>>, vector<1x1x14x14xf32>
    %44 = vector.shape_cast %43 : vector<1x1x14x14xf32> to vector<14x14xf32>
    %45 = vector.shape_cast %37 : vector<14x14xf32> to vector<1x1x14x14xf32>
    tpu.vector_store %arg2[%c0_21, %c3, %c1_22, %c1_23], %45 {strides = array<i32>} : memref<1x4x16x16xf32, #tpu.memory_space<vmem>>, vector<1x1x14x14xf32>,
    %46 = vector.shape_cast %37 : vector<14x14xf32> to vector<1x14x14xf32>
    %cst_24 = arith.constant dense<0x7F800000> : vector<1xf32>
    %47 = vector.multi_reduction <minimumf>, %46, %cst_24 [1, 2] : vector<1x14x14xf32> to vector<1xf32>
    %48 = vector.shape_cast %47 : vector<1xf32> to vector<1x1x1xf32>
    %49 = vector.extract %48[0, 0, 0] : f32 from vector<1x1x1xf32>
    %50 = vector.broadcast %49 : f32 to vector<1x1xf32>
    %c0_25 = arith.constant 0 : index
    %c0_26 = arith.constant 0 : index
    %c0_27 = arith.constant 0 : index
    %51 = vector.load %arg3[%c0_25, %c0_26, %c0_27] : memref<1x1x1xf32, #tpu.memory_space<vmem>>, vector<1x1x1xf32>
    %52 = vector.shape_cast %51 : vector<1x1x1xf32> to vector<1x1xf32>
    %53 = vector.shape_cast %50 : vector<1x1xf32> to vector<1x1x1xf32>
    tpu.vector_store %arg3[%c0_25, %c0_26, %c0_27], %53 {strides = array<i32>} : memref<1x1x1xf32, #tpu.memory_space<vmem>>, vector<1x1x1xf32>,
    %54 = vector.shape_cast %37 : vector<14x14xf32> to vector<1x14x14xf32>
    %cst_28 = arith.constant dense<0xFF800000> : vector<1xf32>
    %55 = vector.multi_reduction <maximumf>, %54, %cst_28 [1, 2] : vector<1x14x14xf32> to vector<1xf32>
    %56 = vector.shape_cast %55 : vector<1xf32> to vector<1x1x1xf32>
    %57 = vector.extract %56[0, 0, 0] : f32 from vector<1x1x1xf32>
    %58 = vector.broadcast %57 : f32 to vector<1x1xf32>
    %c0_29 = arith.constant 0 : index
    %c0_30 = arith.constant 0 : index
    %c0_31 = arith.constant 0 : index
    %59 = vector.load %arg4[%c0_29, %c0_30, %c0_31] : memref<1x1x1xf32, #tpu.memory_space<vmem>>, vector<1x1x1xf32>
    %60 = vector.shape_cast %59 : vector<1x1x1xf32> to vector<1x1xf32>
    %61 = vector.shape_cast %58 : vector<1x1xf32> to vector<1x1x1xf32>
    tpu.vector_store %arg4[%c0_29, %c0_30, %c0_31], %61 {strides = array<i32>} : memref<1x1x1xf32, #tpu.memory_space<vmem>>, vector<1x1x1xf32>,
    return
  }
  func.func @transform_0(%arg0: i32) -> (i32, i32, i32, i32) {
    %c0_i32 = arith.constant 0 : i32
    %c0_i32_0 = arith.constant 0 : i32
    %c0_i32_1 = arith.constant 0 : i32
    %c0_i32_2 = arith.constant 0 : i32
    return %arg0, %c0_i32, %c0_i32_0, %c0_i32_1 : i32, i32, i32, i32
  }
  func.func @transform_1(%arg0: i32) -> (i32, i32, i32, i32) {
    %c0_i32 = arith.constant 0 : i32
    %c0_i32_0 = arith.constant 0 : i32
    %c0_i32_1 = arith.constant 0 : i32
    %c0_i32_2 = arith.constant 0 : i32
    return %arg0, %c0_i32, %c0_i32_0, %c0_i32_1 : i32, i32, i32, i32
  }
  func.func @transform_2(%arg0: i32) -> (i32, i32, i32) {
    %c0_i32 = arith.constant 0 : i32
    %c0_i32_0 = arith.constant 0 : i32
    %c0_i32_1 = arith.constant 0 : i32
    return %arg0, %c0_i32, %c0_i32_0 : i32, i32, i32
  }
  func.func @transform_3(%arg0: i32) -> (i32, i32, i32) {
    %c0_i32 = arith.constant 0 : i32
    %c0_i32_0 = arith.constant 0 : i32
    %c0_i32_1 = arith.constant 0 : i32
    return %arg0, %c0_i32, %c0_i32_0 : i32, i32, i32
  }
}

module attributes {stable_mosaic.version = 11 : i64} {
  func.func @_normalize_pad_kernel(%arg0: i32, %arg1: memref<1x1x16x16xf32, #tpu.memory_space<vmem>>, %arg2: memref<2xf32, #tpu.memory_space<smem>>, %arg3: memref<1x1x16x16xf32, #tpu.memory_space<vmem>>) attributes {dimension_semantics = [#tpu.dimension_semantics<parallel>], iteration_bounds = array<i64: 2>, scalar_prefetch = 0 : i64, scratch_operands = 0 : i64, tpu.core_type = #tpu.core_type<tc>, window_params = [{transform_indices = @transform_0, window_bounds = array<i64: 1, 1, 16, 16>}, {transform_indices = @transform_1, window_bounds = array<i64: 2>}, {transform_indices = @transform_2, window_bounds = array<i64: 1, 1, 16, 16>}]} {
    %c0 = arith.constant 0 : index
    %0 = memref.load %arg2[%c0] : memref<2xf32, #tpu.memory_space<smem>>
    %c1 = arith.constant 1 : index
    %1 = memref.load %arg2[%c1] : memref<2xf32, #tpu.memory_space<smem>>
    %c0_0 = arith.constant 0 : index
    %c0_1 = arith.constant 0 : index
    %c0_2 = arith.constant 0 : index
    %c0_3 = arith.constant 0 : index
    %2 = vector.load %arg1[%c0_0, %c0_1, %c0_2, %c0_3] : memref<1x1x16x16xf32, #tpu.memory_space<vmem>>, vector<1x1x16x16xf32>
    %3 = vector.shape_cast %2 : vector<1x1x16x16xf32> to vector<16x16xf32>
    %4 = vector.broadcast %0 : f32 to vector<16x16xf32>
    %5 = arith.subf %3, %4 : vector<16x16xf32>
    %6 = vector.broadcast %1 : f32 to vector<16x16xf32>
    %7 = arith.mulf %5, %6 : vector<16x16xf32>
    %8 = tpu.iota {dimensions = array<i32: 0>} : vector<16x16xi32>
    %9 = tpu.iota {dimensions = array<i32: 1>} : vector<16x16xi32>
    %c1_i32 = arith.constant 1 : i32
    %10 = vector.broadcast %c1_i32 : i32 to vector<16x16xi32>
    %11 = arith.cmpi sge, %8, %10 : vector<16x16xi32>
    %c15_i32 = arith.constant 15 : i32
    %12 = vector.broadcast %c15_i32 : i32 to vector<16x16xi32>
    %13 = arith.cmpi slt, %8, %12 : vector<16x16xi32>
    %14 = arith.andi %11, %13 : vector<16x16xi1>
    %c1_i32_4 = arith.constant 1 : i32
    %15 = vector.broadcast %c1_i32_4 : i32 to vector<16x16xi32>
    %16 = arith.cmpi sge, %9, %15 : vector<16x16xi32>
    %17 = arith.andi %14, %16 : vector<16x16xi1>
    %c15_i32_5 = arith.constant 15 : i32
    %18 = vector.broadcast %c15_i32_5 : i32 to vector<16x16xi32>
    %19 = arith.cmpi slt, %9, %18 : vector<16x16xi32>
    %20 = arith.andi %17, %19 : vector<16x16xi1>
    %cst = arith.constant 0.000000e+00 : f32
    %21 = vector.broadcast %cst : f32 to vector<16x16xf32>
    %22 = arith.select %20, %7, %21 : vector<16x16xi1>, vector<16x16xf32>
    %c0_6 = arith.constant 0 : index
    %c0_7 = arith.constant 0 : index
    %c0_8 = arith.constant 0 : index
    %c0_9 = arith.constant 0 : index
    %23 = vector.load %arg3[%c0_6, %c0_7, %c0_8, %c0_9] : memref<1x1x16x16xf32, #tpu.memory_space<vmem>>, vector<1x1x16x16xf32>
    %24 = vector.shape_cast %23 : vector<1x1x16x16xf32> to vector<16x16xf32>
    %25 = vector.shape_cast %22 : vector<16x16xf32> to vector<1x1x16x16xf32>
    tpu.vector_store %arg3[%c0_6, %c0_7, %c0_8, %c0_9], %25 {strides = array<i32>} : memref<1x1x16x16xf32, #tpu.memory_space<vmem>>, vector<1x1x16x16xf32>,
    return
  }
  func.func @transform_0(%arg0: i32) -> (i32, i32, i32, i32) {
    %c3_i32 = arith.constant 3 : i32
    %c0_i32 = arith.constant 0 : i32
    %c0_i32_0 = arith.constant 0 : i32
    %c0_i32_1 = arith.constant 0 : i32
    return %arg0, %c3_i32, %c0_i32, %c0_i32_0 : i32, i32, i32, i32
  }
  func.func @transform_1(%arg0: i32) -> i32 {
    %c0_i32 = arith.constant 0 : i32
    %c0_i32_0 = arith.constant 0 : i32
    return %c0_i32 : i32
  }
  func.func @transform_2(%arg0: i32) -> (i32, i32, i32, i32) {
    %c3_i32 = arith.constant 3 : i32
    %c0_i32 = arith.constant 0 : i32
    %c0_i32_0 = arith.constant 0 : i32
    %c0_i32_1 = arith.constant 0 : i32
    return %arg0, %c3_i32, %c0_i32, %c0_i32_0 : i32, i32, i32, i32
  }
}

</mosaic_0001>

<bundles_post_ra>
// kernel: sobel_net_forward.3
= control target key start
LH: loop header
LB: loop body
LE: loop exit
PB: predicated region body
PF: predicated region fallthrough
CT: control target
= control target key end

     0   :  { %7 = vsyncpa [#allocation3], 0  ;;  %s721_s0 = inlined_call_operand.hbm [shape: f32[2,4,16,16], index: 0, kind: input, shape index: {}, may-alias: {0,2}]   ;;  %s722_s1 = inlined_call_operand.vmem [shape: f32[2], index: 1, kind: input, shape index: {}]   ;;  %s723_s2 = inlined_call_operand.hbm [shape: f32[2,4,16,16], index: 2, kind: output, shape index: {}, may-alias: {0,2}]  }
   0x1   :  { %9 = vsyncpa [#allocation3 + $0x1], 0 }
   0x2   :  { %10 = vsyncpa [#allocation5], 0 }
   0x3   :  { %11 = vsyncpa [#allocation4], 0 }
   0x4   :  { %13 = vsyncpa [#allocation4 + $0x1], 0  ;;  %s530_s9 = smov 0   ;;  %s532_s10 = smov 0  }
   0x5   :  { %s534_s11 = smov 0   ;;  %s536_s12 = smov 0  }
   0x6 LB: > { %s551_s13 = sadd.s32 4294967295, %s506_s12   ;;  %s313_s14 = sadd.s32 4294967294, %s506_s12   ;;  %s506_s12 = sphi %s536_s12, %s747_s12   ;;  %s502_s11 = sphi %s534_s11, %s746_s11   ;;  %s498_s10 = sphi %s532_s10, %s745_s10   ;;  %s494_s9 = sphi %s530_s9, %s744_s9  }
   0x7   : > { %s555_s15 = sadd.s32 1, %s506_s12   ;;  %s26_s16 = sadd.s32 1, %s502_s11 }
   0x8   : > { %s23_s17 = ssub.s32 %s506_s12, %s555_s15  ;;  %p33_p0 = scmp.ne.s32.totalorder %s502_s11, %s498_s10 }
   0x9   : > { %p24_p1 = scmp.eq.s32.totalorder %s23_s17, 0  ;;  %p34_p2 = scmp.eq.s32.totalorder %s506_s12, 0 }
   0xa   : > { %p39_p3 = scmp.ne.s32.totalorder %s498_s10, %s494_s9  ;;  %p725_p4 = scmp.eq.s32.totalorder %s551_s13, 0 }
   0xb   : > { %s567_s18 = scalar_select %p24_p1, %s502_s11, %s26_s16  }
   0xc   : > { %p569_p5 = por %p34_p2, %p33_p0  ;;  %p575_p6 = por %p725_p4, %p39_p3 }
   0xd   : > { %p84_p7 = scmp.eq.s32.totalorder %s551_s13, 1  ;;  %p90_p8 = scmp.eq.s32.totalorder %s313_s14, 1 }
   0xe   : > { %s729_s20 = scalar_select %p575_p6, 1, 0 }
   0xf   : > { %p314_p9 = scmp.ge.s32.totalorder %s506_s12, 1  ;;  %p97_p10 = scmp.lt.s32.totalorder %s506_s12, 3 }
  0x10   : > { %p582_p11 = por %p84_p7, %p33_p0  ;;  %p586_p12 = por %p90_p8, %p39_p3 }
  0x11   : > { %p590_p13 = pnand %p314_p9, %p97_p10  ;;  %s110_s26 = sshll.u32 %s722_s1, 4  ;;  %s111_s26 = int_to_ptr.vmem [resolvable:$true] %s110_s26 }
  0x12   : > { %s730_s21 = scalar_select %p582_p11, 1, 0 }
  0x13   : > { %s731_s22 = scalar_select %p586_p12, 1, 0 }
  0x14   : > { %s732_s23 = scalar_select %p590_p13, 1, 0 }
  0x15   : > { %p340_p1 = pneg %p590_p13  ;;  %p353_p2 = scmp.lt.s32.totalorder %s506_s12, 2 }
  0x16   : > { %s121_s28 = sand.u32 1, %s502_s11   ;;  %s393_s3 = scalar_lea.vmem %s111_s26, 16 }
  0x17   : > { %p603_p7 = pnand %p340_p1, %p725_p4  ;;  %p610_p3 = pnand %p353_p2, %p569_p5 }
  0x18   : > { %s317_s30 = sshll.u32 %s121_s28, 4  ;;  %p394_p8 = scmp.ne.s32.totalorder %s111_s26, %s393_s3 }
  0x19   : > { %p395_p9 = pneg %p603_p7  ;;  %p401_p12 = scmp.lt.s32.totalorder %s111_s26, %s111_s26 }
  0x1a   : > { %p402_p11 = scmp.lt.s32.totalorder %s393_s3, %s393_s3 }
  0x1b   : > { %p396_p10 = pnand %p395_p9, %p394_p8 }
  0x1c   : > { %p403_p1 = por %p402_p11, %p401_p12 }
  0x1d   : > { %p397_p0 = pneg %p396_p10 }
  0x1f   : > { %p404_p4 = pnand %p403_p1, %p397_p0 }
  0x21   : > { %407 = shalt.err (!%p404_p4)
}
  0x22   : > { %s508_s4 = smov [#allocation6]   ;;  %s330_s5 = sshll.u32 %s506_s12, 10 }
  0x23   : > { %343 = dma.vmem_to_smem (!%p603_p7), %s111_s26, 16, %s508_s4, [#allocation5]  }
  0x24   : > { %s125_s6 = scalar_lea.vmem [#allocation2], %s317_s30  ;;  %s259_s16 = scalar_lea.hbm %s721_s0, %s330_s5 }
  0x25   : > { %s133_s7 = sshll.u32 %s125_s6, 4  ;;  %s624_s17 = scalar_lea.hbm %s259_s16, 768  ;;  %s622_s7 = int_to_ptr.vmem [resolvable:$true] %s133_s7 }
  0x26   : > { %s626_s19 = scalar_lea.sflag [#allocation3], %s121_s28  ;;  %s436_s24 = scalar_lea.hbm %s259_s16, 1024 }
  0x27   : > { %p409_p4 = scmp.ne.s32.totalorder %s624_s17, %s436_s24  ;;  %p410_p5 = pneg %p610_p3 }
  0x28   : > { %s413_s27 = scalar_lea.hbm %s721_s0, 2048  ;;  %p414_p0 = scmp.lt.s32.totalorder %s624_s17, %s721_s0 }
  0x29   : > { %p411_p11 = pnand %p410_p5, %p409_p4  ;;  %p415_p2 = scmp.lt.s32.totalorder %s413_s27, %s436_s24 }
  0x2b   : > { %p412_p12 = pneg %p411_p11  ;;  %p416_p7 = por %p415_p2, %p414_p0 }
  0x2d   : > { %p417_p8 = pnand %p416_p7, %p412_p12 }
  0x2f   : > { %420 = shalt.err (!%p417_p8)
}
  0x30   : > { %s421_s28 = scalar_lea.vmem %s622_s7, 256  ;;  %s509_s4 = smov [#allocation2]  }
  0x31   : > { %p422_p9 = scmp.ne.s32.totalorder %s622_s7, %s421_s28  ;;  %s426_s5 = sshll.u32 %s509_s4, 4  ;;  %s427_s5 = int_to_ptr.vmem [resolvable:$false] %s426_s5 }
  0x32   : > { %s428_s6 = scalar_lea.vmem %s427_s5, 512  ;;  %p429_p4 = scmp.lt.s32.totalorder %s622_s7, %s427_s5 }
  0x33   : > { %p424_p10 = pnand %p422_p9, %p410_p5  ;;  %p430_p11 = scmp.lt.s32.totalorder %s428_s6, %s421_s28 }
  0x35   : > { %p425_p1 = pneg %p424_p10  ;;  %p431_p6 = por %p430_p11, %p429_p4 }
  0x37   : > { %p432_p13 = pnand %p431_p6, %p425_p1 }
  0x39   : > { %435 = shalt.err (!%p432_p13)
}
  0x3a   : > { %s510_s8 = smov 128   ;;  %s511_s14 = smov 8  }
  0x3b   : > { %347 = dma.hbm_to_vmem [thread:$0]  (!%p610_p3), %s624_s17, 256, %s622_s7, %s626_s19, %s510_s8, %s510_s8, %s511_s14  }
  0x3c   : > { %p735_p5 = scmp.ne.s32.totalorder %s732_s23, 0 }
  0x3d   : > { %s649_s16 = sand.u32 (!%p735_p5), 1, %s498_s10   ;;  %p736_p6 = scmp.ne.s32.totalorder (!%p735_p5), %s729_s20, 0 }
  0x3e   : > { %145 = sbr.rel (%p735_p5) target bundleno = 101 (0x65), region = 28  ;;  %s321_s24 = sshll.u32 (!%p735_p5), %s649_s16, 4 }
  0x3f   : > { %s148_s25 = scalar_lea.sflag (!%p735_p5), [#allocation3], %s649_s16  ;;  %s151_s26 = scalar_lea.vmem (!%p735_p5), [#allocation2], %s321_s24 }
  0x43   : > { %481 = dma.done.wait (%p736_p6), %s148_s25, 256  }
  0x44   : > { %483 = vsyncadd (%p736_p6), %s148_s25, 4294967040  ;;  %p737_p13 = scmp.eq.s32.totalorder %s551_s13, 0 }
  0x46   : > { %485 = dma.done.wait (%p737_p13), [#allocation5], 16   ;;  %p738_p3 = pmov %p737_p13 }
  0x48   : > { %487 = vsyncadd (%p738_p3), [#allocation5], 4294967280 }
  0x49   : > { %160 = sfence }
  0x4a   : > { %s177_s23 = sld [smem:[#allocation6]]  ;;  %v187_v0 = vlaneseq  ;;  %v179_v3 = vld [vmem:[%s151_s26] sm:$0xff]  ;;  %v180_v4 = vld [vmem:[%s151_s26 + $0x8] sm:$0xff]  ;;  %s331_s20 = sshll.u32 %s551_s13, 10  ;;  %vm206_vm8 = vcmask 130048  }
  0x4b   : > { %s324_s29 = sld [smem:[#allocation6 + $0x1]]  ;;  %s176_s7 = scalar_lea.vmem [#allocation7], %s321_s24 }
  0x4c   : > { %v188_v1 = vshrl.u32 %v187_v0, 7  ;;  %v191_v2 = vand.u32 127, %v187_v0  ;;  %s224_s17 = sshll.u32 %s176_s7, 4  ;;  %s670_s13 = scalar_lea.hbm %s723_s2, %s331_s20  ;;  %s672_s17 = int_to_ptr.vmem [resolvable:$true] %s224_s17 }
  0x4d   : > { %s676_s30 = scalar_lea.hbm %s670_s13, 768  ;;  %s210_s3 = scalar_lea.sflag [#allocation4], %s649_s16 }
  0x4e   : > { %vm192_vm0 = vcmp.ge.s32.totalorder %v188_v1, 1  ;;  %vm198_vm1 = vcmp.ge.s32.totalorder %v191_v2, 1  ;;  %vm201_vm2 = vcmp.lt.s32.totalorder %v191_v2, 15  ;;  %v189_v5 = vadd.s32 8, %v188_v1  ;;  %s437_s28 = scalar_lea.vmem %s672_s17, 256  ;;  %p741_p0 = scmp.ne.s32.totalorder %s730_s21, 0 }
  0x4f   : > { %vm199_vm3 = vmand %vm192_vm0, %vm198_vm1  ;;  %p438_p12 = scmp.ne.s32.totalorder %s672_s17, %s437_s28  ;;  %s512_s4 = smov [#allocation7]  }
  0x50   : > { %v181_v6 = vstv %s177_s23  ;;  %vm663_vm4 = vmand %vm199_vm3, %vm201_vm2  ;;  %vm195_vm5 = vcmp.lt.s32.totalorder %v189_v5, 15  ;;  %s441_s5 = sshll.u32 %s512_s4, 4  ;;  %s442_s5 = int_to_ptr.vmem [resolvable:$false] %s441_s5 }
  0x51   : > { %v182_v8 = vsub.f32 %v179_v3, %v181_v6  ;;  %v184_v9 = vstv %s324_s29  ;;  %v183_v10 = vsub.f32 %v180_v4, %v181_v6  ;;  %vm200_vm6 = vmand %vm195_vm5, %vm198_vm1  ;;  %p439_p2 = pnand %p438_p12, %p741_p0  ;;  %s443_s6 = scalar_lea.vmem %s442_s5, 512 }
  0x52   : > { %vm203_vm7 = vmand %vm200_vm6, %vm201_vm2  ;;  %p444_p8 = scmp.lt.s32.totalorder %s672_s17, %s442_s5  ;;  %p445_p9 = scmp.lt.s32.totalorder %s443_s6, %s437_s28 }
  0x53   : > { %v185_v11 = vmul.f32 %v184_v9, %v182_v8  ;;  %v186_v12 = vmul.f32 %v184_v9, %v183_v10  ;;  %p440_p7 = pneg %p439_p2 }
  0x54   : > { %p446_p10 = por %p445_p9, %p444_p8 }
  0x55   : > { %v204_v13 = vsel %vm663_vm4, %v185_v11, 0.0  ;;  %v205_v14 = vsel %vm203_vm7, %v186_v12, 0.0 }
  0x56   : > { %207 = vst.msk [vmem:[%s176_s7] sm:$0xff] %vm206_vm8, %v204_v13  ;;  %208 = vst.msk [vmem:[%s176_s7 + $0x8] sm:$0xff] %vm206_vm8, %v205_v14  ;;  %p447_p1 = pnand %p446_p10, %p440_p7 }
  0x58   : > { %450 = shalt.err (!%p447_p1)
}
  0x59   : > { %s463_s8 = scalar_lea.hbm %s670_s13, 1024  ;;  %s455_s25 = scalar_lea.hbm %s723_s2, 2048 }
  0x5a   : > { %p452_p4 = scmp.ne.s32.totalorder %s676_s30, %s463_s8  ;;  %p456_p6 = scmp.lt.s32.totalorder %s676_s30, %s723_s2 }
  0x5b   : > { %p457_p13 = scmp.lt.s32.totalorder %s455_s25, %s463_s8 }
  0x5c   : > { %p453_p11 = pnand %p452_p4, %p741_p0 }
  0x5d   : > { %p458_p3 = por %p457_p13, %p456_p6 }
  0x5e   : > { %p454_p5 = pneg %p453_p11 }
  0x60   : > { %p459_p12 = pnand %p458_p3, %p454_p5 }
  0x62   : > { %462 = shalt.err (!%p459_p12)
}
  0x63   : > { %s513_s29 = smov 128   ;;  %s514_s20 = smov 8  }
  0x64   : > { %338 = dma.vmem_to_hbm [thread:$0]  (%p741_p0), %s672_s17, 256, %s676_s30, %s210_s3, %s513_s29, %s513_s29, %s514_s20  }
  0x65 PF: > { %s239_s7 = sand.u32 1, %s494_s9   ;;  %p742_p2 = scmp.ne.s32.totalorder %s731_s22, 0 }
  0x66   : > { %p743_p7 = scmp.ge.s32.totalorder %s506_s12, 2  ;;  %s240_s19 = scalar_lea.sflag [#allocation4], %s239_s7 }
  0x68   : > { %p349_p8 = pnand %p743_p7, %p742_p2 }
  0x6a   : > { %p350_p9 = pneg %p349_p8 }
  0x6c   : > { %489 = dma.done.wait (%p350_p9), %s240_s19, 256  }
  0x6d   : > { %491 = vsyncadd (%p350_p9), %s240_s19, 4294967040  ;;  %p16_p10 = scmp.ge.s32.totalorder %s555_s15, 4   ;;  %s744_s9 = smov %s498_s10 }
  0x6e   : > { %s745_s10 = smov %s502_s11  ;;  %s746_s11 = smov %s567_s18 }
  0x6f   : > { %s747_s12 = smov %s555_s15  ;;  %18 = sbr.rel (!%p16_p10) target bundleno = 6 (0x6), region = 78 }
  0x74   :  { %245 = vsyncpa [#allocation3], 1 }
  0x75   :  { %247 = vsyncpa [#allocation3 + $0x1], 1 }
  0x76   :  { %248 = vsyncpa [#allocation4], 1 }
  0x77   :  { %250 = vsyncpa [#allocation4 + $0x1], 1 }
  0x78   :  { %251 = vsyncpa [#allocation5], 1 }
  0x79   :  { %253 = vsyncpa [#allocation5 + $0x1], 1 }

// kernel: sobel_net_forward.2
= control target key start
LH: loop header
LB: loop body
LE: loop exit
PB: predicated region body
PF: predicated region fallthrough
CT: control target
= control target key end

     0   :  { %9 = vsyncpa [#allocation3], 0  ;;  %s890_s0 = inlined_call_operand.hbm [shape: f32[2,3,16,16], index: 0, kind: input, shape index: {}]   ;;  %s891_s1 = inlined_call_operand.hbm [shape: f32[2,4,16,16], index: 1, kind: output, shape index: {0}]   ;;  %s892_s2 = inlined_call_operand.vmem [shape: f32[2,1,1], index: 2, kind: output, shape index: {1}]   ;;  %s893_s3 = inlined_call_operand.vmem [shape: f32[2,1,1], index: 3, kind: output, shape index: {2}]  }
   0x1   :  { %11 = vsyncpa [#allocation3 + $0x1], 0 }
   0x2   :  { %12 = vsyncpa [#allocation4], 0 }
   0x3   :  { %14 = vsyncpa [#allocation4 + $0x1], 0  ;;  %s710_s12 = smov 0   ;;  %s712_s13 = smov 0  }
   0x4   :  { %s714_s14 = smov 0   ;;  %s716_s15 = smov 0  }
   0x5 LB: > { %s731_s16 = sadd.s32 4294967295, %s679_s15   ;;  %s505_s17 = sadd.s32 4294967294, %s679_s15   ;;  %s679_s15 = sphi %s716_s15, %s907_s15   ;;  %s675_s14 = sphi %s714_s14, %s906_s14   ;;  %s671_s13 = sphi %s712_s13, %s905_s13   ;;  %s667_s12 = sphi %s710_s12, %s904_s12  }
   0x6   : > { %s735_s18 = sadd.s32 1, %s679_s15   ;;  %s27_s19 = sadd.s32 1, %s675_s14 }
   0x7   : > { %s24_s20 = ssub.s32 %s679_s15, %s735_s18  ;;  %p34_p0 = scmp.ne.s32.totalorder %s675_s14, %s671_s13 }
   0x8   : > { %p25_p1 = scmp.eq.s32.totalorder %s24_s20, 0  ;;  %p35_p2 = scmp.eq.s32.totalorder %s679_s15, 0 }
   0x9   : > { %p40_p3 = scmp.ne.s32.totalorder %s671_s13, %s667_s12  ;;  %p41_p4 = scmp.eq.s32.totalorder %s731_s16, 0 }
   0xa   : > { %s747_s21 = scalar_select %p25_p1, %s675_s14, %s27_s19  }
   0xb   : > { %p36_p5 = por %p35_p2, %p34_p0  ;;  %p749_p6 = por %p41_p4, %p40_p3 }
   0xc   : > { %p64_p7 = scmp.eq.s32.totalorder %s731_s16, 1  ;;  %p70_p8 = scmp.eq.s32.totalorder %s505_s17, 1 }
   0xd   : > { %s896_s22 = scalar_select %p749_p6, 1, 0 }
   0xe   : > { %p542_p10 = scmp.lt.s32.totalorder %s679_s15, 2  ;;  %p756_p11 = por %p64_p7, %p34_p0 }
   0xf   : > { %p760_p12 = por %p70_p8, %p40_p3  ;;  %s142_s25 = sand.u32 1, %s675_s14  }
  0x10   : > { %s897_s23 = scalar_select %p756_p11, 1, 0 }
  0x11   : > { %s898_s24 = scalar_select %p760_p12, 1, 0 }
  0x12   : > { %s524_s26 = smul.u32 768, %s679_s15  ;;  %p771_p13 = pnand %p542_p10, %p36_p5 }
  0x13   : > { %s523_s27 = smul.u32 48, %s142_s25  ;;  %s777_s7 = scalar_lea.sflag [#allocation3], %s142_s25 }
  0x14   : > { %s769_s30 = scalar_lea.hbm %s890_s0, %s524_s26  ;;  %p589_p1 = pneg %p771_p13 }
  0x15   : > { %s146_s5 = scalar_lea.vmem [#allocation2], %s523_s27  ;;  %s587_s8 = scalar_lea.hbm %s769_s30, 768 }
  0x16   : > { %s153_s6 = sshll.u32 %s146_s5, 4  ;;  %p588_p0 = scmp.ne.s32.totalorder %s769_s30, %s587_s8  ;;  %s775_s6 = int_to_ptr.vmem [resolvable:$true] %s153_s6 }
  0x17   : > { %s592_s11 = scalar_lea.hbm %s890_s0, 1536  ;;  %p593_p4 = scmp.lt.s32.totalorder %s769_s30, %s890_s0 }
  0x18   : > { %p590_p2 = pnand %p589_p1, %p588_p0  ;;  %p594_p5 = scmp.lt.s32.totalorder %s592_s11, %s587_s8 }
  0x1a   : > { %p591_p3 = pneg %p590_p2  ;;  %p595_p7 = por %p594_p5, %p593_p4 }
  0x1c   : > { %p596_p8 = pnand %p595_p7, %p591_p3 }
  0x1e   : > { %599 = shalt.err (!%p596_p8)
}
  0x1f   : > { %s600_s20 = scalar_lea.vmem %s775_s6, 768  ;;  %s681_s25 = smov [#allocation2]  }
  0x20   : > { %p601_p10 = scmp.ne.s32.totalorder %s775_s6, %s600_s20  ;;  %s605_s26 = sshll.u32 %s681_s25, 4  ;;  %s606_s26 = int_to_ptr.vmem [resolvable:$false] %s605_s26 }
  0x21   : > { %s607_s27 = scalar_lea.vmem %s606_s26, 1536  ;;  %p608_p2 = scmp.lt.s32.totalorder %s775_s6, %s606_s26 }
  0x22   : > { %p603_p9 = pnand %p601_p10, %p589_p1  ;;  %p609_p12 = scmp.lt.s32.totalorder %s607_s27, %s600_s20 }
  0x24   : > { %p604_p0 = pneg %p603_p9  ;;  %p610_p11 = por %p609_p12, %p608_p2 }
  0x26   : > { %p611_p6 = pnand %p610_p11, %p604_p0 }
  0x28   : > { %614 = shalt.err (!%p611_p6)
}
  0x29   : > { %s682_s28 = smov 128   ;;  %s683_s29 = smov 8  }
  0x2a   : > { %537 = dma.hbm_to_vmem [thread:$0]  (!%p771_p13), %s769_s30, 768, %s775_s6, %s777_s7, %s682_s28, %s682_s28, %s683_s29  }
  0x2b   : > { %p509_p9 = scmp.ge.s32.totalorder %s679_s15, 1  ;;  %p161_p1 = scmp.lt.s32.totalorder %s679_s15, 3 }
  0x2d   : > { %p162_p3 = pnand %p509_p9, %p161_p1 }
  0x2e   : > { %s801_s5 = sand.u32 (!%p162_p3), 1, %s671_s13   ;;  %p900_p6 = scmp.ne.s32.totalorder (!%p162_p3), %s896_s22, 0 }
  0x2f   : > { %165 = sbr.rel (%p162_p3) target bundleno = 547 (0x223), region = 24  ;;  %s168_s9 = scalar_lea.sflag (!%p162_p3), [#allocation3], %s801_s5 }
  0x30   : > { %s525_s8 = smul.u32 (!%p162_p3), 48, %s801_s5 }
  0x32   : > { %s171_s10 = scalar_lea.vmem (!%p162_p3), [#allocation2], %s525_s8 }
  0x34   : > { %658 = dma.done.wait (%p900_p6), %s168_s9, 768  }
  0x35   : > { %660 = vsyncadd (%p900_p6), %s168_s9, 4294966528  ;;  %s510_s30 = sshll.u32 %s801_s5, 6  ;;  %vm317_vm0 = vcmask 130048   ;;  %v206_v0 = vld [vmem:[%s171_s10] sm:$0xff]  ;;  %v511_v1 = vld [vmem:[%s171_s10 + $0x10] sm:$0xff]  ;;  %s684_s22 = smov 126  }
  0x36   : > { %v513_v2 = vld [vmem:[%s171_s10 + $0x20] sm:$0xff]  ;;  %v214_v3 = vmul.f32 0.299, %v206_v0  ;;  %v216_v4 = vmul.f32 0.587, %v511_v1  ;;  %s810_s4 = scalar_lea.vmem [#allocation5], %s510_s30 }
  0x37   : > { %v220_v5 = vmul.f32 0.114, %v513_v2  ;;  %318 = vst.msk [vmem:[%s810_s4] sm:$0xff] %vm317_vm0, %v206_v0  ;;  %320 = vst.msk [vmem:[%s810_s4 + $0x10] sm:$0xff] %vm317_vm0, %v511_v1  ;;  %v314_v6 = vld [vmem:[%s171_s10 + $0x18] sm:$0xff]  ;;  %v316_v7 = vld [vmem:[%s171_s10 + $0x28] sm:$0xff] }
  0x38   : > { %322 = vst.msk [vmem:[%s810_s4 + $0x20] sm:$0xff] %vm317_vm0, %v513_v2  ;;  %v207_v8 = vld [vmem:[%s171_s10 + $0x8] sm:$0xff]  ;;  %v218_v9 = vadd.f32 %v216_v4, %v214_v3  ;;  %321 = vst.msk [vmem:[%s810_s4 + $0x18] sm:$0xff] %vm317_vm0, %v314_v6  ;;  %v217_v11 = vmul.f32 0.587, %v314_v6  ;;  %s685_s6 = smov 127  }
  0x39   : > { %323 = vst.msk [vmem:[%s810_s4 + $0x28] sm:$0xff] %vm317_vm0, %v316_v7  ;;  %v215_v10 = vmul.f32 0.299, %v207_v8  ;;  %v221_v12 = vmul.f32 0.114, %v316_v7  ;;  %319 = vst.msk [vmem:[%s810_s4 + $0x8] sm:$0xff] %vm317_vm0, %v207_v8 }
  0x3a   : > { %v222_v13 = vadd.f32 %v220_v5, %v218_v9  ;;  %vm228_vm1 = vcmask 1046528   ;;  %vm238_vm2 = vcmask 1045504   ;;  %s686_s7 = smov 2   ;;  %vm274_vm3 = vcmask 1041408   ;;  %s522_s11 = sshll.u32 %s731_s16, 10 }
  0x3b   : > { %v219_v14 = vadd.f32 %v217_v11, %v215_v10  ;;  %vm339_vm4 = vcmask 128016   ;;  %vm337_vm6 = vcmask 130064   ;;  %s388_s17 = sshll.u32 %s810_s4, 4  ;;  %vm335_vm10 = vcmask 119816   ;;  %s835_s25 = scalar_lea.hbm %s891_s1, %s522_s11  ;;  %s837_s17 = int_to_ptr.vmem [resolvable:$true] %s388_s17 }
  0x3c   : > { %v224_v15 = vmul.f32 2.0, %v222_v13  ;;  %264 = vrot.lane.b32.xlu1 %v222_v13, %s684_s22  ;;  %v239_v20 = vrot.slane %v222_v13, 2  ;;  %vm333_vm11 = vcmask 121864   ;;  %s369_s26 = scalar_lea.sflag [#allocation4], %s801_s5  ;;  %s615_s27 = scalar_lea.vmem %s837_s17, 1024 }
  0x3d   : > { %v223_v16 = vadd.f32 %v221_v12, %v219_v14  ;;  %p616_p11 = scmp.ne.s32.totalorder %s837_s17, %s615_s27  ;;  %p901_p12 = scmp.ne.s32.totalorder %s897_s23, 0 }
  0x3e   : > { %256 = vrot.lane.b32.xlu0 %v224_v15, %s685_s6  ;;  %v229_v17 = vrot.slane %v224_v15, 1  ;;  %s687_s28 = smov [#allocation5]  }
  0x3f   : > { %v225_v18 = vmul.f32 2.0, %v223_v16  ;;  %v240_v19 = vrot.slane %v223_v16, 2  ;;  %p617_p13 = pnand %p616_p11, %p901_p12  ;;  %s619_s29 = sshll.u32 %s687_s28, 4  ;;  %s620_s29 = int_to_ptr.vmem [resolvable:$false] %s619_s29 }
  0x40   : > { %266 = vrot.lane.b32.xlu1 %v223_v16, %s684_s22  ;;  %s621_s8 = scalar_lea.vmem %s620_s29, 2048  ;;  %p622_p5 = scmp.lt.s32.totalorder %s837_s17, %s620_s29 }
  0x41   : > { %v230_v21 = vrot.slane %v225_v18, 1  ;;  %v241_v24 = vsel %vm238_vm2, %v239_v20, %v240_v19  ;;  %p618_p4 = pneg %p617_p13  ;;  %p623_p7 = scmp.lt.s32.totalorder %s621_s8, %s615_s27 }
  0x42   : > { %258 = vrot.lane.b32.xlu0 %v225_v18, %s685_s6 }
  0x43   : > { %v235_v22 = vadd.f32 %v230_v21, %v223_v16  ;;  %v231_v23 = vsel %vm228_vm1, %v229_v17, %v230_v21  ;;  %p624_p8 = por %p623_p7, %p622_p5 }
  0x44   : > { %v234_v25 = vadd.f32 %v231_v23, %v222_v13 }
  0x45   : > { %v245_v26 = vadd.f32 %v240_v19, %v235_v22  ;;  %p625_p10 = pnand %p624_p8, %p618_p4 }
  0x46   : > { %v244_v27 = vadd.f32 %v241_v24, %v234_v25 }
  0x47   : > { %250 = vrot.lane.b32.xlu1 %v245_v26, %s686_s7 }
  0x48   : > { %248 = vrot.lane.b32.xlu0 %v244_v27, %s686_s7 }
  0xae   : > { %v265_v28 = vpop.permute.xlu1 %264 }
  0xb0   : > { %v257_v29 = vpop.permute.xlu0 %256 }
  0xb1   : > { %v262_v30 = vadd.f32 %v257_v29, %v222_v13 }
  0xb2   : > { %v267_v33 = vpop.permute.xlu1 %266 }
  0xb3   : > { %v270_v31 = vadd.f32 %v265_v28, %v262_v30 }
  0xb4   : > { %v259_v32 = vpop.permute.xlu0 %258 }
  0xb5   : > { %v275_v34 = vrot.slane %v270_v31, 6  ;;  %v263_v35 = vadd.f32 %v259_v32, %v223_v16 }
  0xb7   : > { %v271_v36 = vadd.f32 %v267_v33, %v263_v35  ;;  %v280_v37 = vsub.f32 %v270_v31, %v275_v34 }
  0xb9   : > { %v276_v38 = vrot.slane %v271_v36, 6  ;;  %v284_v40 = vmul.f32 %v280_v37, %v280_v37  ;;  %v251_v46 = vpop.permute.xlu1 %250 }
  0xba   : > { %v249_v47 = vpop.permute.xlu0 %248  ;;  %v255_v48 = vsub.f32 %v245_v26, %v251_v46 }
  0xbb   : > { %v277_v39 = vsel %vm274_vm3, %v275_v34, %v276_v38  ;;  %v288_v43 = vrot.slane %v284_v40, 2  ;;  %v254_v49 = vsub.f32 %v244_v27, %v249_v47 }
  0xbc   : > { %v281_v41 = vsub.f32 %v271_v36, %v277_v39  ;;  %v283_v50 = vmul.f32 %v255_v48, %v255_v48 }
  0xbd   : > { %v282_v51 = vmul.f32 %v254_v49, %v254_v49 }
  0xbe   : > { %v285_v42 = vmul.f32 %v281_v41, %v281_v41 }
  0xc0   : > { %v289_v44 = vrot.slane %v285_v42, 2 }
  0xc2   : > { %293 = vrot.lane.b32.xlu1 %v289_v44, %s686_s7  ;;  %v290_v45 = vsel %vm238_vm2, %v288_v43, %v289_v44 }
  0xc3   : > { %291 = vrot.lane.b32.xlu0 %v290_v45, %s686_s7 }
 0x134   : > { %v294_v52 = vpop.permute.xlu1 %293 }
 0x135   : > { %v298_v53 = vadd.f32 %v294_v52, %v283_v50  ;;  %v292_v54 = vpop.permute.xlu0 %291 }
 0x136   : > { %v297_v55 = vadd.f32 %v292_v54, %v282_v51 }
 0x137   : > { %583 = vrsqrt.f32 %v298_v53  ;;  %vm308_vm5 = vcmp.eq.f32.partialorder %v298_v53, inf  ;;  %v311_v60 = vand.u32 2147483648, %v298_v53  ;;  %vm310_vm8 = vcmp.eq.f32.partialorder %v298_v53, 0.0 }
 0x138   : > { %585 = vrsqrt.f32 %v297_v55  ;;  %vm301_vm7 = vcmp.eq.f32.partialorder %v297_v55, inf  ;;  %v304_v61 = vand.u32 2147483648, %v297_v55  ;;  %vm303_vm9 = vcmp.eq.f32.partialorder %v297_v55, 0.0 }
 0x144   : > { %v584_v56 = vpop.eup %583 }
 0x145   : > { %v586_v57 = vpop.eup %585  ;;  %v307_v58 = vmul.f32 %v584_v56, %v298_v53 }
 0x146   : > { %v300_v59 = vmul.f32 %v586_v57, %v297_v55 }
 0x147   : > { %v309_v62 = vsel %vm308_vm5, %v298_v53, %v307_v58 }
 0x148   : > { %v302_v63 = vsel %vm301_vm7, %v297_v55, %v300_v59  ;;  %v312_v0 = vsel %vm310_vm8, %v311_v60, %v309_v62 }
 0x149   : > { %v305_v1 = vsel %vm303_vm9, %v304_v61, %v302_v63  ;;  %v355_v2 = vsel %vm339_vm4, %v312_v0, -inf  ;;  %v340_v3 = vsel %vm339_vm4, %v312_v0, inf }
 0x14a   : > { %v354_v4 = vsel %vm337_vm6, %v305_v1, -inf  ;;  %v338_v5 = vsel %vm337_vm6, %v305_v1, inf }
 0x14b   : > { %v356_v6 = vmax.f32 %v354_v4, %v355_v2  ;;  %v341_v7 = vmin.f32 %v338_v5, %v340_v3 }
 0x14d   : > { %357 = vmax.xlane.f32.xlu1 %v356_v6  ;;  %342 = vmin.xlane.f32.xlu0 %v341_v7 }
 0x15e   : > { %328 = vrot.lane.b32.xlu1 %v312_v0, %s685_s6 }
 0x163   : > { %326 = vrot.lane.b32.xlu0 %v305_v1, %s685_s6 }
 0x1d6   : > { %v358_v8 = vpop.xlane.xlu1 %357  ;;  %v343_v9 = vpop.xlane.xlu0 %342 }
 0x1d7   : > { %v359_v10 = vrot.slane %v358_v8, 4  ;;  %v344_v11 = vrot.slane %v343_v9, 4 }
 0x1d9   : > { %v360_v12 = vmax.f32 %v358_v8, %v359_v10  ;;  %v345_v13 = vmin.f32 %v343_v9, %v344_v11 }
 0x1da   : > { %v329_v14 = vpop.permute.xlu1 %328  ;;  %v327_v15 = vpop.permute.xlu0 %326 }
 0x1db   : > { %v361_v16 = vrot.slane %v360_v12, 2  ;;  %v346_v17 = vrot.slane %v345_v13, 2  ;;  %516 = vst.msk [vmem:[%s810_s4 + $0x39] sm:$0x3f] %vm335_vm10, %v329_v14 }
 0x1dc   : > { %515 = vst.msk [vmem:[%s810_s4 + $0x31] sm:$0xff] %vm333_vm11, %v327_v15 }
 0x1dd   : > { %628 = shalt.err (!%p625_p10)
}
 0x1de   : > { %s629_s9 = scalar_lea.hbm %s835_s25, 1024  ;;  %s633_s4 = scalar_lea.hbm %s891_s1, 2048 }
 0x1df   : > { %p630_p0 = scmp.ne.s32.totalorder %s835_s25, %s629_s9  ;;  %p634_p1 = scmp.lt.s32.totalorder %s835_s25, %s891_s1 }
 0x1e0   : > { %p635_p3 = scmp.lt.s32.totalorder %s633_s4, %s629_s9 }
 0x1e1   : > { %p631_p2 = pnand %p630_p0, %p901_p12 }
 0x1e2   : > { %p636_p6 = por %p635_p3, %p634_p1 }
 0x1e3   : > { %p632_p9 = pneg %p631_p2 }
 0x1e5   : > { %p637_p11 = pnand %p636_p6, %p632_p9 }
 0x1e7   : > { %640 = shalt.err (!%p637_p11)
}
 0x1e8   : > { %s688_s7 = smov 128   ;;  %s689_s11 = smov 8   ;;  %v347_v18 = vmin.f32 %v345_v13, %v346_v17  ;;  %v362_v19 = vmax.f32 %v360_v12, %v361_v16  ;;  %vm352_vm12 = vcmask 0  }
 0x1e9   : > { %532 = dma.vmem_to_hbm [thread:$0]  (%p901_p12), %s837_s17, 1024, %s835_s25, %s369_s26, %s688_s7, %s688_s7, %s689_s11  }
 0x1ea   : > { %v348_v20 = vrot.slane %v347_v18, 1  ;;  %v363_v21 = vrot.slane %v362_v19, 1  ;;  %p200_p13 = scmp.lt.s32.totalorder %s731_s16, 1 }
 0x1ec   : > { %v349_v22 = vmin.f32 %v347_v18, %v348_v20  ;;  %v364_v23 = vmax.f32 %v362_v19, %v363_v21  ;;  %s909_s16 = smov (!%p200_p13, %s731_s16), 1 }
 0x1ed   : > { %s202_s27 = scalar_lea.vmem %s892_s2, %s909_s16  ;;  %s205_s5 = scalar_lea.vmem %s893_s3, %s909_s16 }
 0x1ee   : > { %526 = vpush %v349_v22 }
 0x1ef   : > { %528 = vpush %v364_v23 }
 0x21f   : > { %s527_s28 = spop %526 }
 0x220   : > { %v351_v24 = vstv %s527_s28  ;;  %s529_s17 = spop %528 }
 0x221   : > { %353 = vst.msk [vmem:[%s202_s27] sm:$0x1] %vm352_vm12, %v351_v24  ;;  %v366_v25 = vstv %s529_s17 }
 0x222   : > { %367 = vst.msk [vmem:[%s205_s5] sm:$0x1] %vm352_vm12, %v366_v25 }
 0x223 PF: > { %s409_s25 = sand.u32 1, %s667_s12   ;;  %p902_p12 = scmp.ne.s32.totalorder %s898_s24, 0 }
 0x224   : > { %p903_p4 = scmp.ge.s32.totalorder %s679_s15, 2  ;;  %s410_s26 = scalar_lea.sflag [#allocation4], %s409_s25 }
 0x226   : > { %p539_p5 = pnand %p903_p4, %p902_p12 }
 0x228   : > { %p540_p7 = pneg %p539_p5 }
 0x22a   : > { %662 = dma.done.wait (%p540_p7), %s410_s26, 1024  }
 0x22b   : > { %664 = vsyncadd (%p540_p7), %s410_s26, 4294966272  ;;  %p17_p8 = scmp.ge.s32.totalorder %s735_s18, 4   ;;  %s904_s12 = smov %s671_s13 }
 0x22c   : > { %s905_s13 = smov %s675_s14  ;;  %s906_s14 = smov %s747_s21 }
 0x22d   : > { %s907_s15 = smov %s735_s18  ;;  %19 = sbr.rel (!%p17_p8) target bundleno = 5 (0x5), region = 96 }
 0x232   :  { %427 = vsyncpa [#allocation3], 1 }
 0x233   :  { %429 = vsyncpa [#allocation3 + $0x1], 1 }
 0x234   :  { %430 = vsyncpa [#allocation4], 1 }
 0x235   :  { %432 = vsyncpa [#allocation4 + $0x1], 1 }

</bundles_post_ra>
